<compile_context>
chip_gen: v7x
topology: tpu7x:2x2x1
jax: 0.10.0
libtpu: 0.0.40
codegen_flags: <defaults>
</compile_context>

<pallas_src>
import jax
import jax.numpy as jnp
from jax.experimental import pallas as pl
from jax.experimental.pallas import tpu as pltpu


def _round_up(x, m):
    return (x + m - 1) // m * m


def _switched_emb_kernel(x_ref, w_ref, emb_ref, acc_ref):
    """One (token-tile, vocab-tile) step: accumulate onehot @ w_eff tile on the MXU."""
    k = pl.program_id(1)

    @pl.when(k == 0)
    def _init():
        acc_ref[...] = jnp.zeros_like(acc_ref)

    ids = x_ref[...]                                     # (tm, 1) int32
    tm = ids.shape[0]
    tv = w_ref.shape[0]

    # Global vocab index of each lane in this vocab tile.
    lane = jax.lax.broadcasted_iota(jnp.int32, (tm, tv), 1) + k * tv
    onehot = (ids == lane).astype(w_ref.dtype)           # (tm, tv), exact 0/1

    acc_ref[...] += jnp.dot(onehot, w_ref[...],
                            preferred_element_type=jnp.float32)

    @pl.when(k == pl.num_programs(1) - 1)
    def _finalize():
        emb_ref[...] = acc_ref[...].astype(emb_ref.dtype)


def switched_word_emb(x, w_stacked, select_mask, pad_id, *, tm=128, tv_max=512):
    """x: (B, T) int token ids in [0, V); w_stacked: (E, V, D); select_mask: (V,) in [0, E).

    Note: out-of-range token ids produce a zero embedding row (PyTorch would raise).
    """
    B, T = x.shape
    E, V, D = w_stacked.shape

    # ---- resolve the table switch once, outside the kernel (per-vocab, not per-token)
    sel = select_mask.astype(jnp.int32)                   # (V,)
    w_eff = w_stacked[sel, jnp.arange(V), :]              # (V, D)

    # ---- pad to TPU-friendly shapes
    N = B * T
    n_pad = _round_up(max(N, tm), tm)
    d_pad = _round_up(D, 128)                             # lane-dense output stores
    tv = min(tv_max, _round_up(V, 8))
    v_pad = _round_up(V, tv)

    x_flat = x.reshape(N).astype(jnp.int32)
    x_flat = jnp.pad(x_flat, (0, n_pad - N), constant_values=pad_id)
    x_flat = x_flat.reshape(n_pad, 1)
    w_eff = jnp.pad(w_eff, ((0, v_pad - V), (0, d_pad - D)))

    emb = pl.pallas_call(
        _switched_emb_kernel,
        out_shape=jax.ShapeDtypeStruct((n_pad, d_pad), w_stacked.dtype),
        grid_spec=pltpu.PrefetchScalarGridSpec(
            num_scalar_prefetch=0,
            grid=(n_pad // tm, v_pad // tv),
            in_specs=[
                pl.BlockSpec((tm, 1), lambda i, k: (i, 0)),       # token id tile
                pl.BlockSpec((tv, d_pad), lambda i, k: (k, 0)),   # w_eff vocab tile
            ],
            out_specs=pl.BlockSpec((tm, d_pad), lambda i, k: (i, 0)),
            scratch_shapes=[pltpu.VMEM((tm, d_pad), jnp.float32)],
        ),
        compiler_params=pltpu.CompilerParams(
            dimension_semantics=("parallel", "arbitrary")),
    )(x_flat, w_eff)

    emb = emb[:N, :D].reshape(B, T, D)
    mask = (x != pad_id).astype(jnp.int32)                # trivial fused XLA op
    return emb, mask


if __name__ == "__main__":
    # Small synthetic setup consistent with the module:
    #   vocab V=16 (id 0 == "<MASK>" == padding_idx), dim D=32,
    #   base emb + 2 override embs (E=3), batch B=2, seq T=8.
    V, D, E = 16, 32, 3
    B, T = 2, 8
    PAD_ID = 0

    key = jax.random.PRNGKey(0)
    k_base, k_o1, k_o2, k_x = jax.random.split(key, 4)

    # WordEmb.reset_parameters(): uniform(-0.1, 0.1), padding row zeroed.
    base_w = jax.random.uniform(k_base, (V, D), jnp.float32, -0.1, 0.1)
    base_w = base_w.at[PAD_ID].set(0.0)
    o1_w = jax.random.uniform(k_o1, (V, D), jnp.float32, -0.1, 0.1)
    o1_w = o1_w.at[PAD_ID].set(0.0)
    o2_w = jax.random.uniform(k_o2, (V, D), jnp.float32, -0.1, 0.1)
    o2_w = o2_w.at[PAD_ID].set(0.0)
    w_stacked = jnp.stack([base_w, o1_w, o2_w], axis=0)   # (E, V, D)

    # select_mask buffer as SwitchedWordEmb.override() would set it:
    # 0 = base, 1 = first override, 2 = second override.
    select_mask = jnp.zeros((V,), jnp.int32)
    select_mask = select_mask.at[jnp.array([3, 5, 7, 11])].set(1)
    select_mask = select_mask.at[jnp.array([4, 9, 13])].set(2)

    # Token ids, with an explicit <MASK> token to exercise the mask output.
    x = jax.random.randint(k_x, (B, T), 0, V, dtype=jnp.int32)
    x = x.at[0, 0].set(PAD_ID)

    emb, mask = switched_word_emb(x, w_stacked, select_mask, PAD_ID)
    emb, mask = jax.block_until_ready(emb), jax.block_until_ready(mask)

    # Pure-JAX reference (same semantics as the PyTorch forward in eval mode).
    ref_emb = w_stacked[select_mask[x], x, :]             # (B, T, D)
    ref_mask = (x != PAD_ID).astype(jnp.int32)            # (B, T)

    assert emb.shape == (B, T, D) and mask.shape == (B, T)
    assert jnp.allclose(emb, ref_emb, atol=1e-6), "embedding mismatch"
    assert jnp.array_equal(mask, ref_mask), "mask mismatch"
    # TODO(synk): word_dropout path (base.do_word_dropout) is training-only and
    # stateful across batches; omitted since forward here is eval-mode.
    print("KERNEL_OK")
</pallas_src>

<mosaic_0001>
module attributes {stable_mosaic.version = 11 : i64} {
  func.func @_switched_emb_kernel(%arg0: i32, %arg1: i32, %arg2: memref<128x1xi32, #tpu.memory_space<vmem>>, %arg3: memref<16x128xf32, #tpu.memory_space<vmem>>, %arg4: memref<128x128xf32, #tpu.memory_space<vmem>>, %arg5: memref<128x128xf32, #tpu.memory_space<vmem>>) attributes {dimension_semantics = [#tpu.dimension_semantics<parallel>, #tpu.dimension_semantics<arbitrary>], iteration_bounds = array<i64: 1, 1>, scalar_prefetch = 0 : i64, scratch_operands = 1 : i64, tpu.core_type = #tpu.core_type<tc>, window_params = [{transform_indices = @transform_0, window_bounds = array<i64: 128, 1>}, {transform_indices = @transform_1, window_bounds = array<i64: 16, 128>}, {transform_indices = @transform_2, window_bounds = array<i64: 128, 128>}]} {
    %c0_i32 = arith.constant 0 : i32
    %0 = arith.cmpi eq, %arg1, %c0_i32 : i32
    %1 = arith.extui %0 : i1 to i32
    %c0_i32_0 = arith.constant 0 : i32
    %2 = arith.cmpi ne, %1, %c0_i32_0 : i32
    scf.if %2 {
      %cst_10 = arith.constant 0.000000e+00 : f32
      %20 = vector.broadcast %cst_10 : f32 to vector<128x128xf32>
      %c0_11 = arith.constant 0 : index
      %c0_12 = arith.constant 0 : index
      %21 = vector.load %arg5[%c0_11, %c0_12] : memref<128x128xf32, #tpu.memory_space<vmem>>, vector<128x128xf32>
      tpu.vector_store %arg5[%c0_11, %c0_12], %20 {strides = array<i32>} : memref<128x128xf32, #tpu.memory_space<vmem>>, vector<128x128xf32>,
    } else {
    }
    %c0 = arith.constant 0 : index
    %c0_1 = arith.constant 0 : index
    %3 = vector.load %arg2[%c0, %c0_1] : memref<128x1xi32, #tpu.memory_space<vmem>>, vector<128x1xi32>
    %4 = tpu.iota {dimensions = array<i32: 1>} : vector<128x16xi32>
    %c16_i32 = arith.constant 16 : i32
    %5 = arith.muli %arg1, %c16_i32 : i32
    %6 = vector.broadcast %5 : i32 to vector<128x16xi32>
    %7 = arith.addi %4, %6 : vector<128x16xi32>
    %8 = vector.broadcast %3 : vector<128x1xi32> to vector<128x16xi32>
    %9 = arith.cmpi eq, %8, %7 : vector<128x16xi32>
    %10 = arith.extui %9 : vector<128x16xi1> to vector<128x16xi32>
    %11 = arith.sitofp %10 : vector<128x16xi32> to vector<128x16xf32>
    %c0_2 = arith.constant 0 : index
    %c0_3 = arith.constant 0 : index
    %12 = vector.load %arg5[%c0_2, %c0_3] : memref<128x128xf32, #tpu.memory_space<vmem>>, vector<128x128xf32>
    %c0_4 = arith.constant 0 : index
    %c0_5 = arith.constant 0 : index
    %13 = vector.load %arg3[%c0_4, %c0_5] : memref<16x128xf32, #tpu.memory_space<vmem>>, vector<16x128xf32>
    %cst = arith.constant dense<0.000000e+00> : vector<128x128xf32>
    %14 = tpu.matmul %11, %13, %cst {dimension_numbers = #tpu.dot_dimension_numbers<[1], [0], [0], [1], [0, 0, 1, 1], [], []>} : vector<128x16xf32>, vector<16x128xf32>, vector<128x128xf32> -> vector<128x128xf32>
    %15 = arith.addf %12, %14 : vector<128x128xf32>
    %c0_6 = arith.constant 0 : index
    %c0_7 = arith.constant 0 : index
    %16 = vector.load %arg5[%c0_6, %c0_7] : memref<128x128xf32, #tpu.memory_space<vmem>>, vector<128x128xf32>
    tpu.vector_store %arg5[%c0_6, %c0_7], %15 {strides = array<i32>} : memref<128x128xf32, #tpu.memory_space<vmem>>, vector<128x128xf32>,
    %c0_i32_8 = arith.constant 0 : i32
    %17 = arith.cmpi eq, %arg1, %c0_i32_8 : i32
    %18 = arith.extui %17 : i1 to i32
    %c0_i32_9 = arith.constant 0 : i32
    %19 = arith.cmpi ne, %18, %c0_i32_9 : i32
    scf.if %19 {
      %c0_10 = arith.constant 0 : index
      %c0_11 = arith.constant 0 : index
      %20 = vector.load %arg5[%c0_10, %c0_11] : memref<128x128xf32, #tpu.memory_space<vmem>>, vector<128x128xf32>
      %c0_12 = arith.constant 0 : index
      %c0_13 = arith.constant 0 : index
      %21 = vector.load %arg4[%c0_12, %c0_13] : memref<128x128xf32, #tpu.memory_space<vmem>>, vector<128x128xf32>
      tpu.vector_store %arg4[%c0_12, %c0_13], %20 {strides = array<i32>} : memref<128x128xf32, #tpu.memory_space<vmem>>, vector<128x128xf32>,
    } else {
    }
    return
  }
  func.func @transform_0(%arg0: i32, %arg1: i32) -> (i32, i32) {
    %c0_i32 = arith.constant 0 : i32
    %c0_i32_0 = arith.constant 0 : i32
    return %arg0, %c0_i32 : i32, i32
  }
  func.func @transform_1(%arg0: i32, %arg1: i32) -> (i32, i32) {
    %c0_i32 = arith.constant 0 : i32
    %c0_i32_0 = arith.constant 0 : i32
    return %arg1, %c0_i32 : i32, i32
  }
  func.func @transform_2(%arg0: i32, %arg1: i32) -> (i32, i32) {
    %c0_i32 = arith.constant 0 : i32
    %c0_i32_0 = arith.constant 0 : i32
    return %arg0, %c0_i32 : i32, i32
  }
}

</mosaic_0001>

<bundles_post_ra>
// kernel: tpu_custom_call.1
= control target key start
LH: loop header
LB: loop body
LE: loop exit
PB: predicated region body
PF: predicated region fallthrough
CT: control target
= control target key end

     0   :  { %v559_v2 = vmov 0   ;;  %s679_s0 = inlined_call_operand.vmem [shape: s32[128,1], index: 0, kind: input, shape index: {}]   ;;  %s680_s1 = inlined_call_operand.vmem [shape: f32[16,128], index: 1, kind: input, shape index: {}]   ;;  %s681_s2 = inlined_call_operand.hbm [shape: f32[128,128], index: 2, kind: output, shape index: {}]  }
   0x1   :  { %v33_v0 = vld [vmem:[%s679_s0 + $0x8] sm:$0xff]  ;;  %v32_v1 = vld [vmem:[%s679_s0] sm:$0xff]  ;;  %534 = vset.pattern.permute.xlu1 %v559_v2  ;;  %533 = vset.pattern.permute.xlu0 %v559_v2 }
   0x2   :  { %57 = vperm.xlu1 %534, %v33_v0   ;;  %54 = vperm.xlu0 %533, %v32_v1   ;;  %v41_v3 = vld [vmem:[%s679_s0 + $0x48] sm:$0xff]  ;;  %v40_v4 = vld [vmem:[%s679_s0 + $0x40] sm:$0xff] }
   0x3   :  { %v165_v5 = vld [vmem:[%s680_s1] sm:$0xff]  ;;  %v166_v6 = vld [vmem:[%s680_s1 + $0x8] sm:$0xff] }
   0x4   :  { %v522_v7 = vpack.c.bf16 %v166_v6, %v165_v5 }
   0x6   :  { %81 = vperm.xlu1 %534, %v41_v3   ;;  %78 = vperm.xlu0 %533, %v40_v4  }
   0x7   :  { %7 = vsyncpa [#allocation4], 0  ;;  %v42_v8 = vld [vmem:[%s679_s0 + $0x50] sm:$0xff]  ;;  %523 = vmatprep.subr.bf16.mxu0 %v522_v7  ;;  %526 = vmatprep.subr.bf16.mxu1 %v522_v7  ;;  %v43_v10 = vld [vmem:[%s679_s0 + $0x58] sm:$0xff]  ;;  %v48_v20 = vlaneseq  ;;  %vm167_vm0 = vcmask 130048   ;;  %v560_v24 = vmov 0.0  }
   0x8   :  { %v34_v9 = vld [vmem:[%s679_s0 + $0x10] sm:$0xff]  ;;  %525 = vmatpush3.bf16.msra.mxu0 %v522_v7  ;;  %527 = vmatpush3.bf16.msra.mxu1 %v522_v7  ;;  %v35_v11 = vld [vmem:[%s679_s0 + $0x18] sm:$0xff]  ;;  %v44_v12 = vld [vmem:[%s679_s0 + $0x60] sm:$0xff] }
   0x9   :  { %v36_v13 = vld [vmem:[%s679_s0 + $0x20] sm:$0xff]  ;;  %v45_v14 = vld [vmem:[%s679_s0 + $0x68] sm:$0xff]  ;;  %v46_v16 = vld [vmem:[%s679_s0 + $0x70] sm:$0xff]  ;;  %v633_v21 = vand.u32 127, %v48_v20 }
   0xa   :  { %84 = vperm.xlu1 %534, %v42_v8   ;;  %60 = vperm.xlu0 %533, %v34_v9   ;;  %v37_v15 = vld [vmem:[%s679_s0 + $0x28] sm:$0xff]  ;;  %v38_v17 = vld [vmem:[%s679_s0 + $0x30] sm:$0xff]  ;;  %v47_v18 = vld [vmem:[%s679_s0 + $0x78] sm:$0xff] }
   0xb   :  { %v39_v19 = vld [vmem:[%s679_s0 + $0x38] sm:$0xff]  ;;  %s561_s0 = smov [#allocation3]  }
   0xc   :  { %s433_s16 = sshll.u32 %s561_s0, 4  ;;  %s434_s16 = int_to_ptr.vmem [resolvable:$true] %s433_s16 }
   0xd   :  { %s535_s17 = scalar_lea.vmem %s434_s16, 2048  ;;  %p540_p1 = scmp.lt.s32.totalorder %s434_s16, %s434_s16 }
   0xe   :  { %87 = vperm.xlu1 %534, %v43_v10   ;;  %63 = vperm.xlu0 %533, %v35_v11   ;;  %p536_p0 = scmp.ne.s32.totalorder %s434_s16, %s535_s17  ;;  %p541_p2 = scmp.lt.s32.totalorder %s535_s17, %s535_s17 }
  0x10   :  { %p542_p3 = por %p541_p2, %p540_p1 }
  0x12   :  { %90 = vperm.xlu1 %534, %v44_v12   ;;  %66 = vperm.xlu0 %533, %v36_v13   ;;  %p543_p4 = pnand %p542_p3, %p536_p0 }
  0x16   :  { %93 = vperm.xlu1 %534, %v45_v14   ;;  %69 = vperm.xlu0 %533, %v37_v15  }
  0x1a   :  { %96 = vperm.xlu1 %534, %v46_v16   ;;  %72 = vperm.xlu0 %533, %v38_v17  }
  0x1e   :  { %99 = vperm.xlu1 %534, %v47_v18   ;;  %75 = vperm.xlu0 %533, %v39_v19  }
  0x81   :  { %v58_v22 = vpop.permute.xlu1 %57  ;;  %v55_v23 = vpop.permute.xlu0 %54 }
  0x82   :  { %vm102_vm1 = vcmp.eq.s32.totalorder %v58_v22, %v633_v21  ;;  %vm101_vm2 = vcmp.eq.s32.totalorder %v55_v23, %v633_v21 }
  0x83   :  { %v445_v25 = vsel %vm102_vm1, 1.0, %v560_v24  ;;  %v444_v26 = vsel %vm101_vm2, 1.0, %v560_v24 }
  0x84   :  { %498 = vmatprep.mubr.msk.f32.mxu0 %vm167_vm0, %v444_v26 }
  0x85   :  { %v82_v27 = vpop.permute.xlu1 %81  ;;  %499 = vmatmul.mubr.msk.f32.vlgmr.msra.gmra.mrb[0].mxu0 %vm167_vm0, %v445_v25  ;;  %v79_v28 = vpop.permute.xlu0 %78 }
  0x86   :  { %vm110_vm3 = vcmp.eq.s32.totalorder %v82_v27, %v633_v21  ;;  %vm109_vm4 = vcmp.eq.s32.totalorder %v79_v28, %v633_v21 }
  0x87   :  { %v453_v29 = vsel %vm110_vm3, 1.0, %v560_v24  ;;  %v452_v30 = vsel %vm109_vm4, 1.0, %v560_v24 }
  0x88   :  { %510 = vmatprep.mubr.msk.f32.mxu1 %vm167_vm0, %v452_v30 }
  0x89   :  { %v85_v31 = vpop.permute.xlu1 %84  ;;  %511 = vmatmul.mubr.msk.f32.vlgmr.msra.gmra.mrb[0].mxu1 %vm167_vm0, %v453_v29  ;;  %v61_v32 = vpop.permute.xlu0 %60 }
  0x8a   :  { %vm111_vm5 = vcmp.eq.s32.totalorder %v85_v31, %v633_v21  ;;  %vm103_vm6 = vcmp.eq.s32.totalorder %v61_v32, %v633_v21 }
  0x8b   :  { %v454_v33 = vsel %vm111_vm5, 1.0, %v560_v24  ;;  %v446_v34 = vsel %vm103_vm6, 1.0, %v560_v24 }
  0x8c   :  { %501 = vmatprep.mubr.msk.f32.mxu0 %vm167_vm0, %v446_v34  ;;  %513 = vmatprep.mubr.msk.f32.mxu1 %vm167_vm0, %v454_v33 }
  0x8d   :  { %v88_v35 = vpop.permute.xlu1 %87  ;;  %v64_v36 = vpop.permute.xlu0 %63 }
  0x8e   :  { %vm112_vm7 = vcmp.eq.s32.totalorder %v88_v35, %v633_v21  ;;  %vm104_vm8 = vcmp.eq.s32.totalorder %v64_v36, %v633_v21 }
  0x8f   :  { %v455_v37 = vsel %vm112_vm7, 1.0, %v560_v24  ;;  %v447_v38 = vsel %vm104_vm8, 1.0, %v560_v24 }
  0x90   :  { %502 = vmatmul.mubr.msk.f32.gmra.mrb[2].mxu0 %vm167_vm0, %v447_v38  ;;  %514 = vmatmul.mubr.msk.f32.gmra.mrb[2].mxu1 %vm167_vm0, %v455_v37 }
  0x91   :  { %v91_v39 = vpop.permute.xlu1 %90  ;;  %v67_v40 = vpop.permute.xlu0 %66 }
  0x92   :  { %vm113_vm9 = vcmp.eq.s32.totalorder %v91_v39, %v633_v21  ;;  %vm105_vm10 = vcmp.eq.s32.totalorder %v67_v40, %v633_v21 }
  0x93   :  { %v456_v41 = vsel %vm113_vm9, 1.0, %v560_v24  ;;  %v448_v42 = vsel %vm105_vm10, 1.0, %v560_v24 }
  0x94   :  { %504 = vmatprep.mubr.msk.f32.mxu0 %vm167_vm0, %v448_v42  ;;  %516 = vmatprep.mubr.msk.f32.mxu1 %vm167_vm0, %v456_v41 }
  0x95   :  { %v94_v43 = vpop.permute.xlu1 %93  ;;  %v70_v44 = vpop.permute.xlu0 %69 }
  0x96   :  { %vm114_vm11 = vcmp.eq.s32.totalorder %v94_v43, %v633_v21  ;;  %vm106_vm12 = vcmp.eq.s32.totalorder %v70_v44, %v633_v21 }
  0x97   :  { %v457_v45 = vsel %vm114_vm11, 1.0, %v560_v24  ;;  %v449_v46 = vsel %vm106_vm12, 1.0, %v560_v24 }
  0x98   :  { %505 = vmatmul.mubr.msk.f32.gmra.mrb[4].mxu0 %vm167_vm0, %v449_v46  ;;  %517 = vmatmul.mubr.msk.f32.gmra.mrb[4].mxu1 %vm167_vm0, %v457_v45 }
  0x99   :  { %v97_v47 = vpop.permute.xlu1 %96  ;;  %v73_v48 = vpop.permute.xlu0 %72 }
  0x9a   :  { %vm115_vm13 = vcmp.eq.s32.totalorder %v97_v47, %v633_v21  ;;  %vm107_vm14 = vcmp.eq.s32.totalorder %v73_v48, %v633_v21 }
  0x9b   :  { %v458_v49 = vsel %vm115_vm13, 1.0, %v560_v24  ;;  %v450_v50 = vsel %vm107_vm14, 1.0, %v560_v24 }
  0x9c   :  { %507 = vmatprep.mubr.msk.f32.mxu0 %vm167_vm0, %v450_v50  ;;  %519 = vmatprep.mubr.msk.f32.mxu1 %vm167_vm0, %v458_v49 }
  0x9d   :  { %v100_v51 = vpop.permute.xlu1 %99  ;;  %v76_v52 = vpop.permute.xlu0 %75 }
  0x9e   :  { %vm116_vm15 = vcmp.eq.s32.totalorder %v100_v51, %v633_v21  ;;  %vm108_vm1 = vcmp.eq.s32.totalorder %v76_v52, %v633_v21 }
  0x9f   :  { %v459_v53 = vsel %vm116_vm15, 1.0, %v560_v24  ;;  %v451_v54 = vsel %vm108_vm1, 1.0, %v560_v24 }
  0xa0   :  { %508 = vmatmul.mubr.msk.f32.gmra.mrb[6].mxu0 %vm167_vm0, %v451_v54  ;;  %520 = vmatmul.mubr.msk.f32.gmra.mrb[6].mxu1 %vm167_vm0, %v459_v53 }
 0x158   :  { %v500_v55 = vpop.f32.mrb[0].mxu0 }
 0x159   :  { %413 = vst [vmem:[#allocation3 + $0x8] sm:$0xff] %v500_v55  ;;  %v282_v56 = vpop.f32.mrb[1].mxu0 }
 0x15a   :  { %412 = vst [vmem:[#allocation3] sm:$0xff] %v282_v56 }
 0x15c   :  { %v512_v57 = vpop.f32.mrb[0].mxu1 }
 0x15d   :  { %421 = vst [vmem:[#allocation3 + $0x48] sm:$0xff] %v512_v57  ;;  %v322_v58 = vpop.f32.mrb[1].mxu1 }
 0x15e   :  { %420 = vst [vmem:[#allocation3 + $0x40] sm:$0xff] %v322_v58 }
 0x163   :  { %v503_v59 = vpop.f32.mrb[2].mxu0  ;;  %v515_v60 = vpop.f32.mrb[2].mxu1 }
 0x164   :  { %415 = vst [vmem:[#allocation3 + $0x18] sm:$0xff] %v503_v59  ;;  %423 = vst [vmem:[#allocation3 + $0x58] sm:$0xff] %v515_v60  ;;  %v292_v61 = vpop.f32.mrb[3].mxu0  ;;  %v332_v62 = vpop.f32.mrb[3].mxu1 }
 0x165   :  { %414 = vst [vmem:[#allocation3 + $0x10] sm:$0xff] %v292_v61  ;;  %422 = vst [vmem:[#allocation3 + $0x50] sm:$0xff] %v332_v62 }
 0x16b   :  { %v506_v63 = vpop.f32.mrb[4].mxu0  ;;  %v518_v0 = vpop.f32.mrb[4].mxu1 }
 0x16c   :  { %417 = vst [vmem:[#allocation3 + $0x28] sm:$0xff] %v506_v63  ;;  %425 = vst [vmem:[#allocation3 + $0x68] sm:$0xff] %v518_v0  ;;  %v302_v1 = vpop.f32.mrb[5].mxu0  ;;  %v342_v2 = vpop.f32.mrb[5].mxu1 }
 0x16d   :  { %416 = vst [vmem:[#allocation3 + $0x20] sm:$0xff] %v302_v1  ;;  %424 = vst [vmem:[#allocation3 + $0x60] sm:$0xff] %v342_v2 }
 0x173   :  { %v509_v3 = vpop.f32.mrb[6].mxu0  ;;  %v521_v4 = vpop.f32.mrb[6].mxu1 }
 0x174   :  { %419 = vst [vmem:[#allocation3 + $0x38] sm:$0xff] %v509_v3  ;;  %427 = vst [vmem:[#allocation3 + $0x78] sm:$0xff] %v521_v4  ;;  %v312_v5 = vpop.f32.mrb[7].mxu0  ;;  %v352_v6 = vpop.f32.mrb[7].mxu1 }
 0x175   :  { %418 = vst [vmem:[#allocation3 + $0x30] sm:$0xff] %v312_v5  ;;  %426 = vst [vmem:[#allocation3 + $0x70] sm:$0xff] %v352_v6 }
 0x176   :  { %546 = shalt.err (!%p543_p4)
}
 0x177   :  { %s547_s20 = scalar_lea.hbm %s681_s2, 2048 }
 0x178   :  { %p548_p5 = scmp.ne.s32.totalorder %s681_s2, %s547_s20  ;;  %p551_p6 = scmp.lt.u32.totalorder %s547_s20, %s681_s2 }
 0x17a   :  { %p553_p7 = pnand %p551_p6, %p548_p5 }
 0x17c   :  { %556 = shalt.err (!%p553_p7)
}
 0x17d   :  { %s562_s25 = smov 128   ;;  %s563_s1 = smov 8  }
 0x17e   :  { %439 = dma.vmem_to_hbm [thread:$0]  %s434_s16, 2048, %s681_s2, [#allocation4], %s562_s25, %s562_s25, %s563_s1  }
 0x17f   :  { %557 = dma.done.wait [#allocation4], 2048  }
 0x180   :  { %558 = vsyncadd [#allocation4], 4294965248 }
 0x181   :  { %443 = vsyncpa [#allocation4], 1 }

</bundles_post_ra>
